<compile_context>
chip_gen: v5e
topology: v5e:2x2
jax: 0.10.0
libtpu: 0.0.40
codegen_flags: <defaults>
</compile_context>

<pallas_src>
import functools

import jax
import jax.numpy as jnp
from jax.experimental import pallas as pl
from jax.experimental.pallas import tpu as pltpu


def _spatial_attn_kernel(params_ref, masks_ref, x_ref, o_ref, *, C, W, c_chunk):
    """One batch-block per grid step.

    params_ref : SMEM (21,) f32 -- [w[c,kh,kw] c-major (18), bias, bn_scale, bn_shift]
    masks_ref  : VMEM (8, HW_pad) f32 -- rows 0..3 = 0/1 edge-validity masks
    x_ref      : VMEM (NB, C, HW_pad) native dtype -- lane-dense input slab
    o_ref      : VMEM (NB, C, HW_pad) native dtype -- output slab
    """
    NB = x_ref.shape[0]
    HWp = x_ref.shape[2]

    # ---- hoisted scalar parameters (single SMEM read each) ----------------
    w = [params_ref[i] for i in range(18)]       # flat idx = c*9 + kh*3 + kw
    bias = params_ref[18]
    bn_scale = params_ref[19]
    bn_shift = params_ref[20]

    # ---- grid-invariant edge masks, (1, HW_pad) 0/1 floats ----------------
    col_ok_m1 = masks_ref[0:1, :]    # source col-1 valid  (col >= 1)
    col_ok_p1 = masks_ref[1:2, :]    # source col+1 valid  (col <= W-2)
    row_ok_m1 = masks_ref[2:3, :]    # source row-1 valid  (row >= 1)
    row_ok_p1 = masks_ref[3:4, :]    # source row+1 valid  (row <= H-2)

    nfull = C // c_chunk
    rem = C - nfull * c_chunk

    # ---- pass 1: C-chunked channel max / sum (never holds full x) ---------
    xc = x_ref[:, 0:c_chunk, :].astype(jnp.float32)
    x_max = jnp.max(xc, axis=1)                          # (NB, HW_pad)
    x_sum = jnp.sum(xc, axis=1)

    if nfull > 1:
        def red_body(i, carry):
            m, s = carry
            c0 = pl.multiple_of(i * c_chunk, c_chunk)
            xi = x_ref[:, pl.ds(c0, c_chunk), :].astype(jnp.float32)
            return (jnp.maximum(m, jnp.max(xi, axis=1)), s + jnp.sum(xi, axis=1))
        x_max, x_sum = jax.lax.fori_loop(1, nfull, red_body, (x_max, x_sum))

    if rem:
        xi = x_ref[:, nfull * c_chunk:C, :].astype(jnp.float32)
        x_max = jnp.maximum(x_max, jnp.max(xi, axis=1))
        x_sum = x_sum + jnp.sum(xi, axis=1)

    x_mean = x_sum * jnp.float32(1.0 / C)

    # ---- factored 3x3 conv (2 -> 1 ch), padding=1, flat roll+mask form ----
    # column taps (shared by all three kernel rows): 2 rolls + 2 masks / map
    mx_l = pltpu.roll(x_max, shift=1 % HWp, axis=1) * col_ok_m1          # col-1
    mx_r = pltpu.roll(x_max, shift=(HWp - 1) % HWp, axis=1) * col_ok_p1  # col+1
    mn_l = pltpu.roll(x_mean, shift=1 % HWp, axis=1) * col_ok_m1
    mn_r = pltpu.roll(x_mean, shift=(HWp - 1) % HWp, axis=1) * col_ok_p1

    def row_sum(kh):
        b = kh * 3
        return (w[b + 0] * mx_l + w[b + 1] * x_max + w[b + 2] * mx_r +
                w[9 + b + 0] * mn_l + w[9 + b + 1] * x_mean + w[9 + b + 2] * mn_r)

    rs_top = row_sum(0)      # taps sourced from row-1  (dh = -1)
    rs_mid = row_sum(1)
    rs_bot = row_sum(2)      # taps sourced from row+1  (dh = +1)

    acc = (bias + rs_mid
           + pltpu.roll(rs_top, shift=W % HWp, axis=1) * row_ok_m1
           + pltpu.roll(rs_bot, shift=(HWp - W) % HWp, axis=1) * row_ok_p1)

    # Eval-mode BatchNorm folded to scale/shift, then sigmoid (exp on EUP).
    g = jax.nn.sigmoid(acc * bn_scale + bn_shift)        # (NB, HW_pad) f32
    gb = g[:, None, :]                                   # hoisted reshape

    # ---- pass 2: C-chunked gating store ------------------------------------
    xc = x_ref[:, 0:c_chunk, :].astype(jnp.float32)
    o_ref[:, 0:c_chunk, :] = (gb * xc).astype(o_ref.dtype)

    if nfull > 1:
        def gate_body(i, carry):
            c0 = pl.multiple_of(i * c_chunk, c_chunk)
            xi = x_ref[:, pl.ds(c0, c_chunk), :].astype(jnp.float32)
            o_ref[:, pl.ds(c0, c_chunk), :] = (gb * xi).astype(o_ref.dtype)
            return carry
        jax.lax.fori_loop(1, nfull, gate_body, 0)

    if rem:
        xi = x_ref[:, nfull * c_chunk:C, :].astype(jnp.float32)
        o_ref[:, nfull * c_chunk:C, :] = (gb * xi).astype(o_ref.dtype)


def _tpu_budget():
    """Returns (per-step VMEM budget bytes, scoped vmem limit bytes, 2-TC chip?)."""
    try:
        kind = jax.devices()[0].device_kind.lower()
    except Exception:
        kind = ""
    if "v5" in kind or "v6" in kind:
        # 128 MiB physical VMEM, single TensorCore: big blocks, no grid split.
        return 48 << 20, 64 << 20, False
    # v7x (64 MiB physical, 2 TCs) or unknown: stay conservative, split grid.
    return 32 << 20, 48 << 20, True


def _pick_batch_block(N, C, HW_pad, itemsize, vmem_budget, multi_core):
    """Largest divisor of N whose per-step footprint fits the VMEM budget.

    Footprint ~= double-buffered in+out blocks plus ~10 f32 (NB, HW_pad)
    conv/descriptor temporaries. On 2-TC chips keep grid extent >= 4 (even
    split preferred) so both TensorCores stream."""
    per = 4 * C * HW_pad * itemsize + 10 * HW_pad * 4
    cap = max(1, int(vmem_budget // per))
    if multi_core:
        if N >= 4:
            cap = min(cap, N // 4)
        elif N >= 2:
            cap = min(cap, N // 2)
    cap = max(1, min(cap, N))
    divs = [d for d in range(1, cap + 1) if N % d == 0]
    if multi_core:
        even = [d for d in divs if (N // d) % 2 == 0]
        if even:
            return even[-1]
    return divs[-1]


def spatial_attention(x, conv_w, conv_b, bn_gamma, bn_beta, bn_mean, bn_var,
                      eps=1e-5):
    """x: (N, C, H, W). conv_w: (1, 2, 3, 3), conv_b: (1,), bn_*: (1,)."""
    N, C, H, W = x.shape
    HW = H * W
    HW_pad = ((HW + 127) // 128) * 128           # lane-dense last dim

    # Fold eval-mode BN into an affine scale/shift on the conv output.
    scale = (bn_gamma / jnp.sqrt(bn_var + eps)).astype(jnp.float32)
    shift = (bn_beta.astype(jnp.float32) - bn_mean.astype(jnp.float32) * scale)

    # Flat SMEM parameter vector: 18 conv weights + bias + bn scale + bn shift.
    params = jnp.concatenate([
        conv_w.reshape(-1).astype(jnp.float32),   # (18,)
        conv_b.reshape(-1).astype(jnp.float32),   # (1,)
        scale.reshape(-1),                        # (1,)
        shift.reshape(-1),                        # (1,)
    ])                                            # (21,)

    # Native-dtype, lane-dense (and lane-padded) streaming layout.
    x_flat = x.reshape(N, C, HW)
    if HW_pad != HW:
        x_flat = jnp.pad(x_flat, ((0, 0), (0, 0), (0, HW_pad - HW)))

    # Precomputed 0/1 edge-validity masks (grid-invariant; avoids in-kernel
    # div/mod by W).  Pad lanes are 0 so they never contribute to real pixels.
    col = jnp.tile(jnp.arange(W, dtype=jnp.int32), H)
    row = jnp.repeat(jnp.arange(H, dtype=jnp.int32), W)
    valid = jnp.ones((HW,), jnp.float32)
    if HW_pad != HW:
        col = jnp.pad(col, (0, HW_pad - HW))
        row = jnp.pad(row, (0, HW_pad - HW))
        valid = jnp.pad(valid, (0, HW_pad - HW))
    masks = jnp.zeros((8, HW_pad), jnp.float32)
    masks = masks.at[0].set((col >= 1).astype(jnp.float32) * valid)      # dw=-1
    masks = masks.at[1].set((col <= W - 2).astype(jnp.float32) * valid)  # dw=+1
    masks = masks.at[2].set((row >= 1).astype(jnp.float32) * valid)      # dh=-1
    masks = masks.at[3].set((row <= H - 2).astype(jnp.float32) * valid)  # dh=+1

    vmem_budget, vmem_limit, multi_core = _tpu_budget()
    NB = _pick_batch_block(N, C, HW_pad, jnp.dtype(x.dtype).itemsize,
                           vmem_budget, multi_core)
    grid = (N // NB,)
    c_chunk = min(C, 32)

    kernel = functools.partial(_spatial_attn_kernel, C=C, W=W, c_chunk=c_chunk)

    grid_spec = pltpu.PrefetchScalarGridSpec(
        num_scalar_prefetch=0,
        grid=grid,
        in_specs=[
            pl.BlockSpec(memory_space=pltpu.MemorySpace.SMEM),   # params (21,)
            pl.BlockSpec((8, HW_pad), lambda n: (0, 0)),         # edge masks
            pl.BlockSpec((NB, C, HW_pad), lambda n: (n, 0, 0)),  # x slab
        ],
        out_specs=pl.BlockSpec((NB, C, HW_pad), lambda n: (n, 0, 0)),
    )

    out_flat = pl.pallas_call(
        kernel,
        out_shape=jax.ShapeDtypeStruct((N, C, HW_pad), x.dtype),
        grid_spec=grid_spec,
        compiler_params=pltpu.CompilerParams(
            dimension_semantics=("parallel",),
            vmem_limit_bytes=vmem_limit),
    )(params, masks, x_flat)

    if HW_pad != HW:
        out_flat = out_flat[..., :HW]
    return out_flat.reshape(N, C, H, W)


def _reference(x, conv_w, conv_b, bn_gamma, bn_beta, bn_mean, bn_var, eps=1e-5):
    """Pure-JAX reference matching the PyTorch forward (eval-mode BN)."""
    x_max = jnp.max(x, axis=1, keepdims=True)
    x_mean = jnp.mean(x, axis=1, keepdims=True)
    g = jnp.concatenate([x_max, x_mean], axis=1)
    g = jax.lax.conv_general_dilated(
        g, conv_w, window_strides=(1, 1), padding=((1, 1), (1, 1)),
        dimension_numbers=("NCHW", "OIHW", "NCHW"))
    g = g + conv_b.reshape(1, -1, 1, 1)
    scale = bn_gamma / jnp.sqrt(bn_var + eps)
    shift = bn_beta - bn_mean * scale
    g = g * scale.reshape(1, -1, 1, 1) + shift.reshape(1, -1, 1, 1)
    g = jax.nn.sigmoid(g)
    return g * x


if __name__ == "__main__":
    key = jax.random.PRNGKey(0)
    k_x, k_w, k_b = jax.random.split(key, 3)

    N, C, H, W = 2, 4, 16, 16
    x = jax.random.normal(k_x, (N, C, H, W), dtype=jnp.float32)

    # Deterministic parameter init (shapes from the module's __init__).
    conv_w = jax.random.normal(k_w, (1, 2, 3, 3), dtype=jnp.float32) * 0.3
    conv_b = jax.random.normal(k_b, (1,), dtype=jnp.float32) * 0.1
    bn_gamma = jnp.array([1.25], dtype=jnp.float32)
    bn_beta = jnp.array([0.1], dtype=jnp.float32)
    bn_mean = jnp.array([0.05], dtype=jnp.float32)
    bn_var = jnp.array([0.9], dtype=jnp.float32)

    out = spatial_attention(x, conv_w, conv_b, bn_gamma, bn_beta, bn_mean, bn_var)
    out = jax.block_until_ready(out)

    ref = _reference(x, conv_w, conv_b, bn_gamma, bn_beta, bn_mean, bn_var)
    ref = jax.block_until_ready(ref)

    assert out.shape == (N, C, H, W)
    assert jnp.allclose(out, ref, atol=1e-5, rtol=1e-5), (
        f"max abs err {jnp.max(jnp.abs(out - ref))}")

    print("KERNEL_OK")
</pallas_src>

<mosaic_0001>
module attributes {stable_mosaic.version = 11 : i64} {
  func.func @_spatial_attn_kernel(%arg0: i32, %arg1: memref<21xf32, #tpu.memory_space<smem>>, %arg2: memref<8x256xf32, #tpu.memory_space<vmem>>, %arg3: memref<1x4x256xf32, #tpu.memory_space<vmem>>, %arg4: memref<1x4x256xf32, #tpu.memory_space<vmem>>) attributes {dimension_semantics = [#tpu.dimension_semantics<parallel>], iteration_bounds = array<i64: 2>, scalar_prefetch = 0 : i64, scratch_operands = 0 : i64, tpu.core_type = #tpu.core_type<tc>, window_params = [{transform_indices = @transform_0, window_bounds = array<i64: 21>}, {pipeline_mode = #tpu.pipeline_mode<synchronous>, transform_indices = @transform_1, window_bounds = array<i64: 8, 256>}, {transform_indices = @transform_2, window_bounds = array<i64: 1, 4, 256>}, {transform_indices = @transform_3, window_bounds = array<i64: 1, 4, 256>}]} {
    %c0 = arith.constant 0 : index
    %0 = memref.load %arg1[%c0] : memref<21xf32, #tpu.memory_space<smem>>
    %c1 = arith.constant 1 : index
    %1 = memref.load %arg1[%c1] : memref<21xf32, #tpu.memory_space<smem>>
    %c2 = arith.constant 2 : index
    %2 = memref.load %arg1[%c2] : memref<21xf32, #tpu.memory_space<smem>>
    %c3 = arith.constant 3 : index
    %3 = memref.load %arg1[%c3] : memref<21xf32, #tpu.memory_space<smem>>
    %c4 = arith.constant 4 : index
    %4 = memref.load %arg1[%c4] : memref<21xf32, #tpu.memory_space<smem>>
    %c5 = arith.constant 5 : index
    %5 = memref.load %arg1[%c5] : memref<21xf32, #tpu.memory_space<smem>>
    %c6 = arith.constant 6 : index
    %6 = memref.load %arg1[%c6] : memref<21xf32, #tpu.memory_space<smem>>
    %c7 = arith.constant 7 : index
    %7 = memref.load %arg1[%c7] : memref<21xf32, #tpu.memory_space<smem>>
    %c8 = arith.constant 8 : index
    %8 = memref.load %arg1[%c8] : memref<21xf32, #tpu.memory_space<smem>>
    %c9 = arith.constant 9 : index
    %9 = memref.load %arg1[%c9] : memref<21xf32, #tpu.memory_space<smem>>
    %c10 = arith.constant 10 : index
    %10 = memref.load %arg1[%c10] : memref<21xf32, #tpu.memory_space<smem>>
    %c11 = arith.constant 11 : index
    %11 = memref.load %arg1[%c11] : memref<21xf32, #tpu.memory_space<smem>>
    %c12 = arith.constant 12 : index
    %12 = memref.load %arg1[%c12] : memref<21xf32, #tpu.memory_space<smem>>
    %c13 = arith.constant 13 : index
    %13 = memref.load %arg1[%c13] : memref<21xf32, #tpu.memory_space<smem>>
    %c14 = arith.constant 14 : index
    %14 = memref.load %arg1[%c14] : memref<21xf32, #tpu.memory_space<smem>>
    %c15 = arith.constant 15 : index
    %15 = memref.load %arg1[%c15] : memref<21xf32, #tpu.memory_space<smem>>
    %c16 = arith.constant 16 : index
    %16 = memref.load %arg1[%c16] : memref<21xf32, #tpu.memory_space<smem>>
    %c17 = arith.constant 17 : index
    %17 = memref.load %arg1[%c17] : memref<21xf32, #tpu.memory_space<smem>>
    %c18 = arith.constant 18 : index
    %18 = memref.load %arg1[%c18] : memref<21xf32, #tpu.memory_space<smem>>
    %c19 = arith.constant 19 : index
    %19 = memref.load %arg1[%c19] : memref<21xf32, #tpu.memory_space<smem>>
    %c20 = arith.constant 20 : index
    %20 = memref.load %arg1[%c20] : memref<21xf32, #tpu.memory_space<smem>>
    %c0_0 = arith.constant 0 : index
    %c0_1 = arith.constant 0 : index
    %21 = vector.load %arg2[%c0_0, %c0_1] : memref<8x256xf32, #tpu.memory_space<vmem>>, vector<1x256xf32>
    %c1_2 = arith.constant 1 : index
    %c0_3 = arith.constant 0 : index
    %22 = vector.load %arg2[%c1_2, %c0_3] : memref<8x256xf32, #tpu.memory_space<vmem>>, vector<1x256xf32>
    %c2_4 = arith.constant 2 : index
    %c0_5 = arith.constant 0 : index
    %23 = vector.load %arg2[%c2_4, %c0_5] : memref<8x256xf32, #tpu.memory_space<vmem>>, vector<1x256xf32>
    %c3_6 = arith.constant 3 : index
    %c0_7 = arith.constant 0 : index
    %24 = vector.load %arg2[%c3_6, %c0_7] : memref<8x256xf32, #tpu.memory_space<vmem>>, vector<1x256xf32>
    %c0_8 = arith.constant 0 : index
    %c0_9 = arith.constant 0 : index
    %c0_10 = arith.constant 0 : index
    %25 = vector.load %arg3[%c0_8, %c0_9, %c0_10] : memref<1x4x256xf32, #tpu.memory_space<vmem>>, vector<1x4x256xf32>
    %cst = arith.constant dense<0xFF800000> : vector<1x256xf32>
    %26 = vector.multi_reduction <maximumf>, %25, %cst [1] : vector<1x4x256xf32> to vector<1x256xf32>
    %cst_11 = arith.constant dense<0.000000e+00> : vector<1x256xf32>
    %27 = vector.multi_reduction <add>, %25, %cst_11 [1] : vector<1x4x256xf32> to vector<1x256xf32>
    %cst_12 = arith.constant 2.500000e-01 : f32
    %28 = vector.broadcast %cst_12 : f32 to vector<1x256xf32>
    %29 = arith.mulf %27, %28 : vector<1x256xf32>
    %c1_i32 = arith.constant 1 : i32
    %30 = tpu.dynamic_rotate %26 by %c1_i32 dim 1 : vector<1x256xf32>, i32 -> vector<1x256xf32>
    %31 = arith.mulf %30, %21 : vector<1x256xf32>
    %c255_i32 = arith.constant 255 : i32
    %32 = tpu.dynamic_rotate %26 by %c255_i32 dim 1 : vector<1x256xf32>, i32 -> vector<1x256xf32>
    %33 = arith.mulf %32, %22 : vector<1x256xf32>
    %c1_i32_13 = arith.constant 1 : i32
    %34 = tpu.dynamic_rotate %29 by %c1_i32_13 dim 1 : vector<1x256xf32>, i32 -> vector<1x256xf32>
    %35 = arith.mulf %34, %21 : vector<1x256xf32>
    %c255_i32_14 = arith.constant 255 : i32
    %36 = tpu.dynamic_rotate %29 by %c255_i32_14 dim 1 : vector<1x256xf32>, i32 -> vector<1x256xf32>
    %37 = arith.mulf %36, %22 : vector<1x256xf32>
    %38 = vector.broadcast %0 : f32 to vector<1x256xf32>
    %39 = arith.mulf %38, %31 : vector<1x256xf32>
    %40 = vector.broadcast %1 : f32 to vector<1x256xf32>
    %41 = arith.mulf %40, %26 : vector<1x256xf32>
    %42 = arith.addf %39, %41 : vector<1x256xf32>
    %43 = vector.broadcast %2 : f32 to vector<1x256xf32>
    %44 = arith.mulf %43, %33 : vector<1x256xf32>
    %45 = arith.addf %42, %44 : vector<1x256xf32>
    %46 = vector.broadcast %9 : f32 to vector<1x256xf32>
    %47 = arith.mulf %46, %35 : vector<1x256xf32>
    %48 = arith.addf %45, %47 : vector<1x256xf32>
    %49 = vector.broadcast %10 : f32 to vector<1x256xf32>
    %50 = arith.mulf %49, %29 : vector<1x256xf32>
    %51 = arith.addf %48, %50 : vector<1x256xf32>
    %52 = vector.broadcast %11 : f32 to vector<1x256xf32>
    %53 = arith.mulf %52, %37 : vector<1x256xf32>
    %54 = arith.addf %51, %53 : vector<1x256xf32>
    %55 = vector.broadcast %3 : f32 to vector<1x256xf32>
    %56 = arith.mulf %55, %31 : vector<1x256xf32>
    %57 = vector.broadcast %4 : f32 to vector<1x256xf32>
    %58 = arith.mulf %57, %26 : vector<1x256xf32>
    %59 = arith.addf %56, %58 : vector<1x256xf32>
    %60 = vector.broadcast %5 : f32 to vector<1x256xf32>
    %61 = arith.mulf %60, %33 : vector<1x256xf32>
    %62 = arith.addf %59, %61 : vector<1x256xf32>
    %63 = vector.broadcast %12 : f32 to vector<1x256xf32>
    %64 = arith.mulf %63, %35 : vector<1x256xf32>
    %65 = arith.addf %62, %64 : vector<1x256xf32>
    %66 = vector.broadcast %13 : f32 to vector<1x256xf32>
    %67 = arith.mulf %66, %29 : vector<1x256xf32>
    %68 = arith.addf %65, %67 : vector<1x256xf32>
    %69 = vector.broadcast %14 : f32 to vector<1x256xf32>
    %70 = arith.mulf %69, %37 : vector<1x256xf32>
    %71 = arith.addf %68, %70 : vector<1x256xf32>
    %72 = vector.broadcast %6 : f32 to vector<1x256xf32>
    %73 = arith.mulf %72, %31 : vector<1x256xf32>
    %74 = vector.broadcast %7 : f32 to vector<1x256xf32>
    %75 = arith.mulf %74, %26 : vector<1x256xf32>
    %76 = arith.addf %73, %75 : vector<1x256xf32>
    %77 = vector.broadcast %8 : f32 to vector<1x256xf32>
    %78 = arith.mulf %77, %33 : vector<1x256xf32>
    %79 = arith.addf %76, %78 : vector<1x256xf32>
    %80 = vector.broadcast %15 : f32 to vector<1x256xf32>
    %81 = arith.mulf %80, %35 : vector<1x256xf32>
    %82 = arith.addf %79, %81 : vector<1x256xf32>
    %83 = vector.broadcast %16 : f32 to vector<1x256xf32>
    %84 = arith.mulf %83, %29 : vector<1x256xf32>
    %85 = arith.addf %82, %84 : vector<1x256xf32>
    %86 = vector.broadcast %17 : f32 to vector<1x256xf32>
    %87 = arith.mulf %86, %37 : vector<1x256xf32>
    %88 = arith.addf %85, %87 : vector<1x256xf32>
    %89 = vector.broadcast %18 : f32 to vector<1x256xf32>
    %90 = arith.addf %89, %71 : vector<1x256xf32>
    %c16_i32 = arith.constant 16 : i32
    %91 = tpu.dynamic_rotate %54 by %c16_i32 dim 1 : vector<1x256xf32>, i32 -> vector<1x256xf32>
    %92 = arith.mulf %91, %23 : vector<1x256xf32>
    %93 = arith.addf %90, %92 : vector<1x256xf32>
    %c240_i32 = arith.constant 240 : i32
    %94 = tpu.dynamic_rotate %88 by %c240_i32 dim 1 : vector<1x256xf32>, i32 -> vector<1x256xf32>
    %95 = arith.mulf %94, %24 : vector<1x256xf32>
    %96 = arith.addf %93, %95 : vector<1x256xf32>
    %97 = vector.broadcast %19 : f32 to vector<1x256xf32>
    %98 = arith.mulf %96, %97 : vector<1x256xf32>
    %99 = vector.broadcast %20 : f32 to vector<1x256xf32>
    %100 = arith.addf %98, %99 : vector<1x256xf32>
    %101 = arith.negf %100 : vector<1x256xf32>
    %102 = math.exp %101 : vector<1x256xf32>
    %cst_15 = arith.constant 1.000000e+00 : f32
    %103 = vector.broadcast %cst_15 : f32 to vector<1x256xf32>
    %104 = arith.addf %103, %102 : vector<1x256xf32>
    %105 = arith.divf %103, %104 : vector<1x256xf32>
    %106 = vector.shape_cast %105 : vector<1x256xf32> to vector<1x1x256xf32>
    %c0_16 = arith.constant 0 : index
    %c0_17 = arith.constant 0 : index
    %c0_18 = arith.constant 0 : index
    %107 = vector.load %arg3[%c0_16, %c0_17, %c0_18] : memref<1x4x256xf32, #tpu.memory_space<vmem>>, vector<1x4x256xf32>
    %108 = vector.broadcast %106 : vector<1x1x256xf32> to vector<1x4x256xf32>
    %109 = arith.mulf %108, %107 : vector<1x4x256xf32>
    %c0_19 = arith.constant 0 : index
    %c0_20 = arith.constant 0 : index
    %c0_21 = arith.constant 0 : index
    %110 = vector.load %arg4[%c0_19, %c0_20, %c0_21] : memref<1x4x256xf32, #tpu.memory_space<vmem>>, vector<1x4x256xf32>
    tpu.vector_store %arg4[%c0_19, %c0_20, %c0_21], %109 {strides = array<i32>} : memref<1x4x256xf32, #tpu.memory_space<vmem>>, vector<1x4x256xf32>,
    return
  }
  func.func @transform_0(%arg0: i32) -> i32 {
    %c0_i32 = arith.constant 0 : i32
    %c0_i32_0 = arith.constant 0 : i32
    return %c0_i32 : i32
  }
  func.func @transform_1(%arg0: i32) -> (i32, i32) {
    %c0_i32 = arith.constant 0 : i32
    %c0_i32_0 = arith.constant 0 : i32
    %c0_i32_1 = arith.constant 0 : i32
    return %c0_i32, %c0_i32_0 : i32, i32
  }
  func.func @transform_2(%arg0: i32) -> (i32, i32, i32) {
    %c0_i32 = arith.constant 0 : i32
    %c0_i32_0 = arith.constant 0 : i32
    %c0_i32_1 = arith.constant 0 : i32
    return %arg0, %c0_i32, %c0_i32_0 : i32, i32, i32
  }
  func.func @transform_3(%arg0: i32) -> (i32, i32, i32) {
    %c0_i32 = arith.constant 0 : i32
    %c0_i32_0 = arith.constant 0 : i32
    %c0_i32_1 = arith.constant 0 : i32
    return %arg0, %c0_i32, %c0_i32_0 : i32, i32, i32
  }
}

</mosaic_0001>

<bundles_post_ra>
// kernel: tpu_custom_call.1
= control target key start
LH: loop header
LB: loop body
LE: loop exit
PB: predicated region body
PF: predicated region fallthrough
CT: control target
= control target key end

     0   :  { %s1214_s0 = inlined_call_operand.hbm [shape: f32[21], index: 0, kind: input, shape index: {}]   ;;  %s1215_s1 = inlined_call_operand.hbm [shape: f32[8,256], index: 1, kind: input, shape index: {}]   ;;  %s1216_s2 = inlined_call_operand.hbm [shape: f32[2,4,256], index: 2, kind: input, shape index: {}]   ;;  %s1217_s3 = inlined_call_operand.hbm [shape: f32[2,4,256], index: 3, kind: output, shape index: {}]  }
   0x1   :  { %1219 = sst [smem:[#allocation14_spill]] %s1214_s0 }
   0x2   :  { %8 = vsyncpa [#allocation5], 0 }
   0x3   :  { %9 = vsyncpa [#allocation3], 0 }
   0x4   :  { %10 = vsyncpa [#allocation8], 0 }
   0x5   :  { %12 = vsyncpa [#allocation8 + $0x1], 0 }
   0x6   :  { %13 = vsyncpa [#allocation4], 0 }
   0x7   :  { %15 = vsyncpa [#allocation4 + $0x1], 0  ;;  %s922_s12 = smov 0   ;;  %s924_s13 = smov 0  }
   0x8   :  { %s926_s14 = smov 0   ;;  %s928_s15 = smov 0  }
   0x9 LB: > { %s943_s16 = sadd.s32 4294967295, %s894_s15   ;;  %s624_s17 = sadd.s32 4294967294, %s894_s15   ;;  %s894_s15 = sphi %s928_s15, %s1231_s15   ;;  %s890_s14 = sphi %s926_s14, %s1230_s14   ;;  %s886_s13 = sphi %s924_s13, %s1229_s13   ;;  %s882_s12 = sphi %s922_s12, %s1228_s12  }
   0xa   : > { %p83_p0 = scmp.ne.s32.totalorder %s886_s13, %s882_s12  ;;  %p84_p1 = scmp.eq.s32.totalorder %s943_s16, 0 }
   0xb   : > { %p107_p2 = scmp.eq.s32.totalorder %s943_s16, 1  ;;  %p113_p3 = scmp.eq.s32.totalorder %s624_s17, 1 }
   0xc   : > { %p952_p4 = por %p84_p1, %p83_p0  ;;  %p625_p5 = scmp.ge.s32.totalorder %s894_s15, 1 }
   0xd   : > { %p957_p6 = por %p113_p3, %p83_p0  ;;  %p120_p7 = scmp.lt.s32.totalorder %s894_s15, 3 }
   0xe   : > { %s1222_s0 = sld [smem:[#allocation14_spill]]  ;;  %s142_s26 = sshll.u32 %s1215_s1, 4  ;;  %s143_s26 = int_to_ptr.hbm [resolvable:$true] %s142_s26 }
   0xf   : > { %p965_p8 = pnand %p625_p5, %p120_p7  ;;  %s896_s27 = smov [#allocation6]  }
  0x10   : > { %s144_s28 = sshll.u32 %s896_s27, 4  ;;  %s897_s29 = smov [#allocation2]   ;;  %s145_s28 = int_to_ptr.vmem [resolvable:$true] %s144_s28 }
  0x11   : > { %p678_p10 = pneg %p965_p8  ;;  %s978_s30 = sadd.s32 1, %s894_s15  }
  0x12   : > { %s70_s4 = sadd.s32 1, %s890_s14  ;;  %s67_s5 = ssub.s32 %s894_s15, %s978_s30 }
  0x13   : > { %p679_p11 = pnand %p678_p10, %p84_p1  ;;  %p77_p12 = scmp.ne.s32.totalorder %s890_s14, %s886_s13 }
  0x14   : > { %s132_s22 = sshll.u32 %s1222_s0, 4  ;;  %p68_p13 = scmp.eq.s32.totalorder %s67_s5, 0  ;;  %s133_s22 = int_to_ptr.hbm [resolvable:$true] %s132_s22 }
  0x15   : > { %681 = dma.hbm_to_smem (!%p679_p11), %s133_s22, 16, %s897_s29, [#allocation5]  }
  0x16   : > { %684 = dma.hbm_to_vmem [thread:$0]  (!%p679_p11), %s143_s26, 256, %s145_s28, [#allocation3]  }
  0x17   : > { %p78_p0 = scmp.eq.s32.totalorder %s894_s15, 0  ;;  %p988_p3 = por %p107_p2, %p77_p12 }
  0x18   : > { %p695_p5 = scmp.lt.s32.totalorder %s894_s15, 2  ;;  %s155_s8 = sand.u32 1, %s890_s14  }
  0x19   : > { %s994_s7 = scalar_select %p68_p13, %s890_s14, %s70_s4  }
  0x1a   : > { %p79_p7 = por %p78_p0, %p77_p12  ;;  %s629_s9 = sshll.u32 %s155_s8, 3 }
  0x1b   : > { %s664_s10 = sshll.u32 %s894_s15, 3  ;;  %s159_s21 = scalar_lea.vmem [#allocation7], %s629_s9 }
  0x1c   : > { %s164_s20 = scalar_lea.hbm %s1216_s2, %s664_s10  ;;  %s168_s22 = sshll.u32 %s159_s21, 4  ;;  %s169_s22 = int_to_ptr.vmem [resolvable:$true] %s168_s22 }
  0x1d   : > { %s166_s24 = sshll.u32 %s164_s20, 4  ;;  %p1001_p2 = pnand %p695_p5, %p79_p7  ;;  %s167_s24 = int_to_ptr.hbm [resolvable:$true] %s166_s24 }
  0x1e   : > { %s156_s26 = scalar_lea.sflag [#allocation8], %s155_s8  ;;  %s790_s27 = sshra.s32 %s167_s24, 4  ;;  %s791_s27 = int_to_ptr.hbm [resolvable:$true] %s790_s27 }
  0x1f   : > { %s792_s28 = scalar_lea.hbm %s791_s27, 8  ;;  %p794_p11 = pneg %p1001_p2 }
  0x20   : > { %p793_p10 = scmp.ne.s32.totalorder %s791_s27, %s792_s28  ;;  %s797_s5 = scalar_lea.hbm %s1216_s2, 16 }
  0x21   : > { %p798_p0 = scmp.lt.s32.totalorder %s791_s27, %s1216_s2  ;;  %p799_p5 = scmp.lt.s32.totalorder %s797_s5, %s792_s28 }
  0x22   : > { %p795_p12 = pnand %p794_p11, %p793_p10 }
  0x23   : > { %p800_p7 = por %p799_p5, %p798_p0 }
  0x24   : > { %p796_p13 = pneg %p795_p12 }
  0x26   : > { %p801_p9 = pnand %p800_p7, %p796_p13 }
  0x28   : > { %804 = shalt.err (!%p801_p9)
}
  0x29   : > { %688 = dma.hbm_to_vmem [thread:$0]  (!%p1001_p2), %s167_s24, 128, %s169_s22, %s156_s26  }
  0x2a   : > { %177 = sbr.rel (%p965_p8) target bundleno = 382 (0x17e), region = 32 }
  0x2f   : > { %865 = dma.done.wait (%p84_p1), [#allocation5], 16  }
  0x30   : > { %867 = vsyncadd (%p84_p1), [#allocation5], 4294967280 }
  0x31   : > { %869 = dma.done.wait (%p84_p1), [#allocation3], 256  }
  0x32   : > { %871 = vsyncadd (%p84_p1), [#allocation3], 4294967040  ;;  %s1026_s8 = sand.u32 1, %s886_s13  }
  0x33   : > { %s1218_s23 = sshll.u32 %s1026_s8, 3  ;;  %s190_s11 = scalar_lea.sflag [#allocation8], %s1026_s8 }
  0x34   : > { %s193_s17 = scalar_lea.vmem [#allocation7], %s1218_s23 }
  0x35   : > { %873 = dma.done.wait (%p952_p4), %s190_s11, 128  }
  0x36   : > { %875 = vsyncadd (%p952_p4), %s190_s11, 4294967168 }
  0x37   : > { %199 = sfence }
  0x38   : > { %v246_v0 = vld [vmem:[%s193_s17] sm:$0xff]  ;;  %vm253_vm0 = vcmask 1043456   ;;  %s898_s18 = smov 127   ;;  %s899_s20 = smov 1   ;;  %v293_v36 = vlaneseq }
  0x39   : > { %248 = vst [vmem:[#allocation1] ss:$2 sm:$0xff] %v246_v0  ;;  %s1056_s21 = sld [smem:[#allocation2 + $0x9]]  ;;  %v239_v38 = vld [vmem:[#allocation6] ss:$8 sm:$0x3] }
  0x3a   : > { %s1058_s22 = sld [smem:[#allocation2 + $0xc]]  ;;  %v1082_v37 = vand.u32 127, %v293_v36  ;;  %v1088_v39 = vld [vmem:[#allocation6 + $0x1] ss:$8 sm:$0x3]  ;;  %v299_v44 = vperm.slane %v239_v38, 0 }
  0x3b   : > { %s1060_s24 = sld [smem:[#allocation2 + $0xf]]  ;;  %v300_v45 = vperm.slane %v239_v38, 1  ;;  %v313_v48 = vperm.slane %v1088_v39, 0  ;;  %v314_v49 = vperm.slane %v1088_v39, 1 }
  0x3c   : > { %s1062_s25 = sld [smem:[#allocation2 + $0x2]]  ;;  %vm295_vm1 = vcmp.lt.s32.totalorder %v1082_v37, 1  ;;  %vm309_vm2 = vcmp.lt.s32.totalorder %v1082_v37, 127  ;;  %vm426_vm3 = vcmp.lt.s32.totalorder %v1082_v37, 16  ;;  %vm442_vm4 = vcmp.lt.s32.totalorder %v1082_v37, 112 }
  0x3d   : > { %s1064_s26 = sld [smem:[#allocation2 + $0x5]] }
  0x3e   : > { %s1066_s27 = sld [smem:[#allocation2 + $0x8]] }
  0x3f   : > { %s1068_s28 = sld [smem:[#allocation2]]  ;;  %v348_v40 = vstv %s1056_s21 }
  0x40   : > { %v249_v1 = vld.sshfl [vmem:[#allocation1] sm:$0xff pattern:$0x75316420]  ;;  %v250_v2 = vld.sshfl [vmem:[#allocation1 + $0x8] sm:$0xff pattern:$0x75316420]  ;;  %v376_v41 = vstv %s1058_s22 }
  0x41   : > { %v254_v3 = vsel %vm253_vm0, %v249_v1, -inf  ;;  %v261_v4 = vsel %vm253_vm0, %v250_v2, -inf  ;;  %268 = vst [vmem:[#allocation1] ss:$2 sm:$0xff] %v246_v0  ;;  %s1070_s29 = sld [smem:[#allocation2 + $0x1]]  ;;  %v404_v46 = vstv %s1060_s24 }
  0x42   : > { %v255_v5 = vrot.slane %v254_v3, 4  ;;  %v262_v6 = vrot.slane %v261_v4, 4  ;;  %s1072_s4 = sld [smem:[#allocation2 + $0x3]]  ;;  %v343_v51 = vstv %s1062_s25  ;;  %s665_s25 = sshll.u32 %s943_s16, 3 }
  0x43   : > { %s1074_s5 = sld [smem:[#allocation2 + $0x4]]  ;;  %v371_v52 = vstv %s1064_s26  ;;  %s1226_s16 = sshll.u32 %s1026_s8, 3 }
  0x44   : > { %v256_v7 = vmax.f32 %v254_v3, %v255_v5  ;;  %v263_v8 = vmax.f32 %v261_v4, %v262_v6  ;;  %s1076_s9 = sld [smem:[#allocation2 + $0x6]]  ;;  %v399_v53 = vstv %s1066_s27 }
  0x45   : > { %s1078_s10 = sld [smem:[#allocation2 + $0x7]]  ;;  %v335_v55 = vstv %s1068_s28  ;;  %s525_s28 = scalar_lea.hbm %s1217_s3, %s665_s25 }
  0x46   : > { %v257_v9 = vrot.slane %v256_v7, 2  ;;  %v264_v10 = vrot.slane %v263_v8, 2  ;;  %s1080_s11 = sld [smem:[#allocation2 + $0x10]] }
  0x47   : > { %s1084_s17 = sld [smem:[#allocation2 + $0xa]]  ;;  %v338_v50 = vstv %s1070_s29  ;;  %s217_s29 = scalar_lea.vmem [#allocation9], %s1226_s16 }
  0x48   : > { %v258_v11 = vmax.f32 %v256_v7, %v257_v9  ;;  %v270_v12 = vld.sshfl [vmem:[#allocation1 + $0x8] sm:$0xff pattern:$0x75316420]  ;;  %v269_v13 = vld.sshfl [vmem:[#allocation1] sm:$0xff pattern:$0x75316420]  ;;  %v265_v17 = vmax.f32 %v263_v8, %v264_v10  ;;  %v363_v56 = vstv %s1072_s4 }
  0x49   : > { %v280_v14 = vsel %vm253_vm0, %v270_v12, 0.0  ;;  %v273_v15 = vsel %vm253_vm0, %v269_v13, 0.0  ;;  %500 = vst [vmem:[#allocation1] ss:$2 sm:$0xff] %v246_v0  ;;  %s1094_s23 = sld [smem:[#allocation2 + $0xb]]  ;;  %v366_v54 = vstv %s1074_s5  ;;  %s527_s4 = sshll.u32 %s217_s29, 4  ;;  %s528_s4 = int_to_ptr.vmem [resolvable:$true] %s527_s4 }
  0x4a   : > { %v259_v16 = vrot.slane %v258_v11, 1  ;;  %v281_v18 = vrot.slane %v280_v14, 4  ;;  %v274_v19 = vrot.slane %v273_v15, 4  ;;  %v266_v23 = vrot.slane %v265_v17, 1  ;;  %s1098_s0 = sld [smem:[#allocation2 + $0xd]]  ;;  %s529_s5 = sshll.u32 %s525_s28, 4  ;;  %s530_s5 = int_to_ptr.hbm [resolvable:$true] %s529_s5 }
  0x4b   : > { %v394_v57 = vstv %s1078_s10  ;;  %v391_v2 = vstv %s1076_s9  ;;  %s654_s21 = sld [smem:[#allocation2 + $0x12]]  ;;  %s514_s9 = scalar_lea.sflag [#allocation4], %s1026_s8 }
  0x4c   : > { %v1040_v20 = vmax.f32 %v258_v11, %v259_v16  ;;  %v282_v21 = vadd.f32 %v281_v18, %v280_v14  ;;  %v275_v22 = vadd.f32 %v274_v19, %v273_v15  ;;  %v1044_v28 = vmax.f32 %v265_v17, %v266_v23  ;;  %s655_s22 = sld [smem:[#allocation2 + $0x13]]  ;;  %s834_s10 = sshra.s32 %s530_s5, 4  ;;  %s835_s10 = int_to_ptr.hbm [resolvable:$true] %s834_s10 }
  0x4d   : > { %v409_v58 = vstv %s1080_s11  ;;  %v353_v62 = vstv %s1084_s17  ;;  %s656_s24 = sld [smem:[#allocation2 + $0x14]]  ;;  %s836_s11 = scalar_lea.hbm %s835_s10, 8 }
  0x4e   : > { %305 = vrot.lane.b32.xlu1 %v1040_v20, %s898_s18  ;;  %289 = vrot.lane.b32.xlu0 %v1040_v20, %s899_s20  ;;  %v283_v24 = vrot.slane %v282_v21, 2  ;;  %v276_v25 = vrot.slane %v275_v22, 2  ;;  %v339_v61 = vmul.f32 %v338_v50, %v1040_v20  ;;  %v340_v63 = vmul.f32 %v338_v50, %v1044_v28  ;;  %p837_p1 = scmp.ne.s32.totalorder %s835_s10, %s836_s11  ;;  %p841_p9 = scmp.lt.s32.totalorder %s835_s10, %s1217_s3 }
  0x4f   : > { %v367_v0 = vmul.f32 %v366_v54, %v1040_v20  ;;  %v368_v1 = vmul.f32 %v366_v54, %v1044_v28  ;;  %v395_v3 = vmul.f32 %v394_v57, %v1040_v20  ;;  %v396_v4 = vmul.f32 %v394_v57, %v1044_v28 }
  0x50   : > { %v284_v26 = vadd.f32 %v283_v24, %v282_v21  ;;  %v277_v27 = vadd.f32 %v276_v25, %v275_v22  ;;  %v358_v14 = vstv %s1094_s23  ;;  %v381_v16 = vstv %s1098_s0  ;;  %s900_s0 = smov 16   ;;  %s901_s23 = smov 112  }
  0x51   : > { %p838_p4 = pnand %p837_p1, %p988_p3 }
  0x52   : > { %v285_v29 = vrot.slane %v284_v26, 1  ;;  %v278_v30 = vrot.slane %v277_v27, 1 }
  0x53   : > { %p839_p8 = pneg %p838_p4 }
  0x54   : > { %v279_v31 = vadd.f32 %v278_v30, %v277_v27  ;;  %v286_v32 = vadd.f32 %v285_v29, %v284_v26 }
  0x56   : > { %307 = vrot.lane.b32.xlu1 %v1044_v28, %s898_s18  ;;  %291 = vrot.lane.b32.xlu0 %v1044_v28, %s899_s20  ;;  %v1048_v33 = vmul.f32 0.25, %v279_v31  ;;  %v1051_v34 = vmul.f32 0.25, %v286_v32 }
  0x58   : > { %319 = vrot.lane.b32.xlu2 %v1048_v33, %s899_s20  ;;  %v1126_v6 = vmul.f32 %v409_v58, %v1048_v33  ;;  %v355_v9 = vmul.f32 %v353_v62, %v1051_v34  ;;  %v354_v10 = vmul.f32 %v353_v62, %v1048_v33  ;;  %v1133_v15 = vmul.f32 %v409_v58, %v1051_v34 }
  0x59   : > { %v382_v27 = vmul.f32 %v381_v16, %v1048_v33  ;;  %v383_v28 = vmul.f32 %v381_v16, %v1051_v34 }
  0x5e   : > { %329 = vrot.lane.b32.xlu1 %v1051_v34, %s898_s18  ;;  %327 = vrot.lane.b32.xlu0 %v1048_v33, %s898_s18  ;;  %s1086_s18 = sld [smem:[#allocation2 + $0xe]] }
  0x60   : > { %321 = vrot.lane.b32.xlu2 %v1051_v34, %s899_s20  ;;  %s1090_s20 = sld [smem:[#allocation2 + $0x11]] }
  0x64   : > { %v386_v5 = vstv %s1086_s18 }
  0x66   : > { %v414_v13 = vstv %s1090_s20  ;;  %s840_s20 = scalar_lea.hbm %s1217_s3, 16 }
  0x67   : > { %p842_p2 = scmp.lt.s32.totalorder %s840_s20, %s836_s11 }
  0x69   : > { %p843_p10 = por %p842_p2, %p841_p9 }
  0x6b   : > { %p844_p11 = pnand %p843_p10, %p839_p8 }
  0xb2   : > { %v320_v35 = vpop.permute.xlu2 %319 }
  0xba   : > { %v322_v47 = vpop.permute.xlu2 %321 }
  0xbb   : > { %v323_v59 = vsel %vm295_vm1, %v320_v35, %v322_v47  ;;  %v324_v60 = vsel %vm295_vm1, %v322_v47, %v320_v35 }
  0xbc   : > { %v325_v7 = vmul.f32 %v324_v60, %v299_v44  ;;  %v326_v8 = vmul.f32 %v323_v59, %v300_v45 }
  0xbe   : > { %v349_v25 = vmul.f32 %v348_v40, %v325_v7  ;;  %v350_v26 = vmul.f32 %v348_v40, %v326_v8  ;;  %v377_v29 = vmul.f32 %v376_v41, %v325_v7  ;;  %v405_v30 = vmul.f32 %v404_v46, %v325_v7 }
  0xbf   : > { %v378_v7 = vmul.f32 %v376_v41, %v326_v8 }
  0xc0   : > { %v306_v42 = vpop.permute.xlu1 %305  ;;  %v290_v43 = vpop.permute.xlu0 %289 }
  0xc8   : > { %v308_v11 = vpop.permute.xlu1 %307  ;;  %v292_v12 = vpop.permute.xlu0 %291 }
  0xc9   : > { %v310_v17 = vsel %vm309_vm2, %v306_v42, %v308_v11  ;;  %v311_v18 = vsel %vm309_vm2, %v308_v11, %v306_v42  ;;  %v296_v19 = vsel %vm295_vm1, %v290_v43, %v292_v12  ;;  %v297_v20 = vsel %vm295_vm1, %v292_v12, %v290_v43 }
  0xca   : > { %v317_v21 = vmul.f32 %v313_v48, %v310_v17  ;;  %v318_v22 = vmul.f32 %v314_v49, %v311_v18  ;;  %v303_v23 = vmul.f32 %v299_v44, %v297_v20  ;;  %v304_v24 = vmul.f32 %v300_v45, %v296_v19 }
  0xcb   : > { %v406_v11 = vmul.f32 %v404_v46, %v326_v8 }
  0xcc   : > { %v344_v31 = vmul.f32 %v343_v51, %v317_v21  ;;  %v345_v32 = vmul.f32 %v343_v51, %v318_v22  ;;  %v372_v35 = vmul.f32 %v371_v52, %v317_v21  ;;  %v373_v36 = vmul.f32 %v371_v52, %v318_v22 }
  0xcd   : > { %v336_v38 = vmul.f32 %v335_v55, %v303_v23  ;;  %v337_v42 = vmul.f32 %v335_v55, %v304_v24  ;;  %v364_v43 = vmul.f32 %v363_v56, %v303_v23  ;;  %v365_v47 = vmul.f32 %v363_v56, %v304_v24 }
  0xce   : > { %v392_v44 = vmul.f32 %v391_v2, %v303_v23  ;;  %v393_v45 = vmul.f32 %v391_v2, %v304_v24  ;;  %v400_v50 = vmul.f32 %v399_v53, %v317_v21  ;;  %v401_v40 = vmul.f32 %v399_v53, %v318_v22 }
  0xcf   : > { %v341_v54 = vadd.f32 %v339_v61, %v336_v38  ;;  %v342_v33 = vadd.f32 %v340_v63, %v337_v42  ;;  %v369_v57 = vadd.f32 %v367_v0, %v364_v43  ;;  %v370_v34 = vadd.f32 %v368_v1, %v365_v47 }
  0xd0   : > { %v397_v58 = vadd.f32 %v395_v3, %v392_v44  ;;  %v398_v59 = vadd.f32 %v396_v4, %v393_v45  ;;  %v330_v60 = vpop.permute.xlu1 %329  ;;  %v328_v51 = vpop.permute.xlu0 %327 }
  0xd1   : > { %v331_v52 = vsel %vm309_vm2, %v328_v51, %v330_v60  ;;  %v332_v55 = vsel %vm309_vm2, %v330_v60, %v328_v51  ;;  %v347_v56 = vadd.f32 %v345_v32, %v342_v33  ;;  %v346_v62 = vadd.f32 %v344_v31, %v341_v54 }
  0xd2   : > { %v374_v53 = vadd.f32 %v372_v35, %v369_v57  ;;  %v375_v61 = vadd.f32 %v373_v36, %v370_v34  ;;  %v333_v63 = vmul.f32 %v331_v52, %v313_v48  ;;  %v334_v0 = vmul.f32 %v332_v55, %v314_v49 }
  0xd3   : > { %v402_v1 = vadd.f32 %v400_v50, %v397_v58  ;;  %v352_v2 = vadd.f32 %v350_v26, %v347_v56  ;;  %v351_v3 = vadd.f32 %v349_v25, %v346_v62  ;;  %v403_v4 = vadd.f32 %v401_v40, %v398_v59 }
  0xd4   : > { %v415_v12 = vmul.f32 %v414_v13, %v333_v63  ;;  %v360_v16 = vmul.f32 %v358_v14, %v334_v0  ;;  %v359_v20 = vmul.f32 %v358_v14, %v333_v63  ;;  %v387_v48 = vmul.f32 %v386_v5, %v333_v63 }
  0xd5   : > { %v407_v17 = vadd.f32 %v405_v30, %v402_v1  ;;  %v357_v18 = vadd.f32 %v355_v9, %v352_v2  ;;  %v356_v19 = vadd.f32 %v354_v10, %v351_v3  ;;  %v388_v39 = vmul.f32 %v386_v5, %v334_v0  ;;  %v245_v30 = vld [vmem:[#allocation6 + $0x3] ss:$8 sm:$0x3] }
  0xd6   : > { %v379_v49 = vadd.f32 %v377_v29, %v374_v53  ;;  %v380_v21 = vadd.f32 %v378_v7, %v375_v61  ;;  %v408_v24 = vadd.f32 %v406_v11, %v403_v4  ;;  %v416_v14 = vmul.f32 %v414_v13, %v334_v0  ;;  %v243_v29 = vld [vmem:[#allocation6 + $0x2] ss:$8 sm:$0x3] }
  0xd7   : > { %v412_v22 = vadd.f32 %v1126_v6, %v407_v17  ;;  %v362_v23 = vadd.f32 %v360_v16, %v357_v18  ;;  %v361_v41 = vadd.f32 %v359_v20, %v356_v19  ;;  %v419_v31 = vstv %s654_s21 }
  0xd8   : > { %v384_v46 = vadd.f32 %v382_v27, %v379_v49  ;;  %v385_v8 = vadd.f32 %v383_v28, %v380_v21  ;;  %v413_v5 = vadd.f32 %v1133_v15, %v408_v24  ;;  %v430_v27 = vperm.slane %v243_v29, 0 }
  0xd9   : > { %v417_v25 = vadd.f32 %v415_v12, %v412_v22  ;;  %424 = vrot.lane.b32.xlu0 %v362_v23, %s900_s0  ;;  %422 = vrot.lane.b32.xlu2 %v361_v41, %s900_s0  ;;  %v431_v28 = vperm.slane %v243_v29, 1  ;;  %v446_v32 = vperm.slane %v245_v30, 0  ;;  %v447_v35 = vperm.slane %v245_v30, 1 }
  0xda   : > { %v389_v9 = vadd.f32 %v387_v48, %v384_v46  ;;  %v390_v10 = vadd.f32 %v388_v39, %v385_v8  ;;  %v418_v26 = vadd.f32 %v416_v14, %v413_v5  ;;  %v454_v58 = vstv %s655_s22  ;;  %v502_v8 = vld.sshfl [vmem:[#allocation1 + $0x8] sm:$0xff pattern:$0x75316420] }
  0xdb   : > { %438 = vrot.lane.b32.xlu1 %v417_v25, %s901_s23  ;;  %v457_v60 = vstv %s656_s24 }
  0xdc   : > { %v420_v43 = vadd.f32 %v419_v31, %v389_v9  ;;  %v421_v47 = vadd.f32 %v419_v31, %v390_v10  ;;  %v501_v10 = vld.sshfl [vmem:[#allocation1] sm:$0xff pattern:$0x75316420] }
  0xe1   : > { %440 = vrot.lane.b32.xlu2 %v418_v26, %s901_s23 }
 0x133   : > { %v423_v6 = vpop.permute.xlu2 %422 }
 0x13b   : > { %v441_v38 = vpop.permute.xlu2 %440 }
 0x14b   : > { %v425_v15 = vpop.permute.xlu0 %424 }
 0x14c   : > { %v427_v36 = vsel %vm426_vm3, %v423_v6, %v425_v15  ;;  %v428_v13 = vsel %vm426_vm3, %v425_v15, %v423_v6 }
 0x14d   : > { %v439_v42 = vpop.permute.xlu1 %438  ;;  %v434_v44 = vmul.f32 %v430_v27, %v428_v13  ;;  %v435_v45 = vmul.f32 %v431_v28, %v427_v36 }
 0x14e   : > { %v443_v50 = vsel %vm442_vm4, %v439_v42, %v441_v38  ;;  %v444_v40 = vsel %vm442_vm4, %v441_v38, %v439_v42 }
 0x14f   : > { %v450_v54 = vmul.f32 %v446_v32, %v443_v50  ;;  %v451_v33 = vmul.f32 %v447_v35, %v444_v40  ;;  %v436_v57 = vadd.f32 %v434_v44, %v420_v43  ;;  %v437_v34 = vadd.f32 %v435_v45, %v421_v47 }
 0x151   : > { %v452_v59 = vadd.f32 %v450_v54, %v436_v57  ;;  %v453_v37 = vadd.f32 %v451_v33, %v437_v34 }
 0x153   : > { %v455_v51 = vmul.f32 %v454_v58, %v452_v59  ;;  %v456_v52 = vmul.f32 %v454_v58, %v453_v37 }
 0x155   : > { %v458_v55 = vadd.f32 %v457_v60, %v455_v51  ;;  %v459_v56 = vadd.f32 %v457_v60, %v456_v52 }
 0x157   : > { %v657_v62 = vmul.f32 -1.442695, %v458_v55  ;;  %v658_v53 = vmul.f32 -1.442695, %v459_v56 }
 0x159   : > { %737 = vpow2.f32 %v657_v62 }
 0x15a   : > { %739 = vpow2.f32 %v658_v53 }
 0x15f   : > { %v738_v61 = vpop.eup %737 }
 0x160   : > { %v740_v63 = vpop.eup %739  ;;  %v466_v0 = vadd.f32 1.0, %v738_v61 }
 0x161   : > { %v467_v1 = vadd.f32 1.0, %v740_v63 }
 0x162   : > { %741 = vrcp.f32 %v466_v0  ;;  %v479_v12 = vand.u32 2147483648, %v466_v0  ;;  %v477_v18 = vand.u32 2147483647, %v466_v0  ;;  %vm473_vm7 = vweird.f32 %v466_v0 }
 0x163   : > { %743 = vrcp.f32 %v467_v1  ;;  %v494_v19 = vand.u32 2147483648, %v467_v1  ;;  %v492_v48 = vand.u32 2147483647, %v467_v1  ;;  %vm488_vm9 = vweird.f32 %v467_v1 }
 0x164   : > { %v480_v49 = vor.u32 1.1754944e-38, %v479_v12  ;;  %vm478_vm10 = vcmp.eq.f32.partialorder %v477_v18, 8.507059e+37 }
 0x165   : > { %v495_v23 = vor.u32 1.1754944e-38, %v494_v19  ;;  %vm493_vm12 = vcmp.eq.f32.partialorder %v492_v48, 8.507059e+37 }
 0x168   : > { %v742_v2 = vpop.eup %741 }
 0x169   : > { %v744_v3 = vpop.eup %743  ;;  %v469_v4 = vmul.f32 %v742_v2, %v466_v0  ;;  %vm474_vm5 = vweird.f32 %v742_v2 }
 0x16a   : > { %v484_v7 = vmul.f32 %v744_v3, %v467_v1  ;;  %vm489_vm6 = vweird.f32 %v744_v3  ;;  %vm475_vm8 = vmor %vm473_vm7, %vm474_vm5 }
 0x16b   : > { %v470_v11 = vsub.f32 1.0, %v469_v4  ;;  %vm490_vm11 = vmor %vm488_vm9, %vm489_vm6 }
 0x16c   : > { %v485_v16 = vsub.f32 1.0, %v484_v7 }
 0x16d   : > { %v471_v17 = vmul.f32 %v742_v2, %v470_v11 }
 0x16e   : > { %v486_v20 = vmul.f32 %v744_v3, %v485_v16 }
 0x16f   : > { %v472_v39 = vadd.f32 %v742_v2, %v471_v17 }
 0x170   : > { %v487_v21 = vadd.f32 %v744_v3, %v486_v20 }
 0x171   : > { %v476_v22 = vsel %vm475_vm8, %v742_v2, %v472_v39 }
 0x172   : > { %v481_v41 = vsel %vm478_vm10, %v480_v49, %v476_v22  ;;  %v491_v24 = vsel %vm490_vm11, %v744_v3, %v487_v21 }
 0x173   : > { %v496_v46 = vsel %vm493_vm12, %v495_v23, %v491_v24  ;;  %v498_v25 = vperm.slane %v481_v41, 0 }
 0x174   : > { %v499_v9 = vperm.slane %v496_v46, 0 }
 0x175   : > { %v505_v14 = vmul.f32 %v501_v10, %v498_v25 }
 0x176   : > { %v506_v5 = vmul.f32 %v502_v8, %v499_v9 }
 0x178   : > { %v509_v26 = vrot.slane %v506_v5, 4 }
 0x17a   : > { %v510_v6 = vsel %vm253_vm0, %v505_v14, %v509_v26 }
 0x17b   : > { %512 = vst [vmem:[%s217_s29] sm:$0xff] %v510_v6 }
 0x17c   : > { %847 = shalt.err (!%p844_p11)
}
 0x17d   : > { %676 = dma.vmem_to_hbm [thread:$0]  (%p988_p3), %s528_s4, 128, %s530_s5, %s514_s9  }
 0x17e PF: > { %s541_s8 = sand.u32 1, %s882_s12   ;;  %p1227_p12 = scmp.ge.s32.totalorder %s894_s15, 2 }
 0x17f   : > { %s542_s21 = scalar_lea.sflag [#allocation4], %s541_s8 }
 0x180   : > { %p690_p13 = pnand %p1227_p12, %p957_p6 }
 0x182   : > { %p691_p0 = pneg %p690_p13 }
 0x184   : > { %877 = dma.done.wait (%p691_p0), %s542_s21, 128  }
 0x185   : > { %879 = vsyncadd (%p691_p0), %s542_s21, 4294967168  ;;  %p18_p5 = scmp.ge.s32.totalorder %s978_s30, 4   ;;  %s1228_s12 = smov %s886_s13 }
 0x186   : > { %s1229_s13 = smov %s890_s14  ;;  %s1230_s14 = smov %s994_s7 }
 0x187   : > { %s1231_s15 = smov %s978_s30  ;;  %20 = sbr.rel (!%p18_p5) target bundleno = 9 (0x9), region = 90 }
 0x18c   :  { %548 = vsyncpa [#allocation3], 1 }
 0x18d   :  { %550 = vsyncpa [#allocation3 + $0x1], 1 }
 0x18e   :  { %551 = vsyncpa [#allocation8], 1 }
 0x18f   :  { %553 = vsyncpa [#allocation8 + $0x1], 1 }
 0x190   :  { %554 = vsyncpa [#allocation4], 1 }
 0x191   :  { %556 = vsyncpa [#allocation4 + $0x1], 1 }
 0x192   :  { %557 = vsyncpa [#allocation5], 1 }
 0x193   :  { %559 = vsyncpa [#allocation5 + $0x1], 1 }

</bundles_post_ra>
